<compile_context>
chip_gen: v6e
topology: v6e:2x2x1
jax: 0.10.0
libtpu: 0.0.40
codegen_flags: <defaults>
</compile_context>

<pallas_src>
import jax
import jax.numpy as jnp
from jax.experimental import pallas as pl
from jax.experimental.pallas import tpu as pltpu

_LANES = 128
_VMEM_LIMIT = 32 * 1024 * 1024          # v5e scoped default is 16 MiB; <= v7x physical
_BLOCK_TARGET_BYTES = 8 * 1024 * 1024   # in+out VMEM footprint per block (pre double-buffer)
_MAX_BLOCK_ROWS = 4096


# --------------------------------------------------------------------------
# helpers
# --------------------------------------------------------------------------
def _pad128(n):
    return ((n + _LANES - 1) // _LANES) * _LANES


def _sublane_multiple(dtype):
    # 8 rows per sublane tile for 4-byte, 16 for 2-byte, 32 for 1-byte dtypes.
    return max(8, 32 // jnp.dtype(dtype).itemsize)


def _pick_block_rows(total, padded_row_bytes, sublane, target_bytes):
    """Slab rows per grid step: big blocks, >=8 steps, even step count."""
    if total <= sublane:
        return total
    tr = min(_MAX_BLOCK_ROWS, max(sublane, target_bytes // max(padded_row_bytes, 1)))
    tr -= tr % sublane
    tr = max(tr, sublane)
    # Keep >= 8 pipelined steps (>= 4 per v7x TensorCore) when the array allows it.
    if total >= 8 * sublane:
        cap = (total // 8) - (total // 8) % sublane
        tr = min(tr, max(sublane, cap))
    if tr >= total:
        return total
    steps = -(-total // tr)
    if steps % 2:  # prefer an even step count so v7x's two cores stay balanced
        alt = -(-total // (steps + 1))
        alt += (-alt) % sublane
        if sublane <= alt < total:
            tr = alt
    return tr


def _choose_group(total_rows, w, upsample):
    """Image rows packed per slab row: lane-dense, divisibility-aware."""
    if upsample:
        cap, start, step = max(1, _LANES // w), 1, 1
    else:
        # g must be even so 2x2 pooling pairs never straddle a packed group.
        cap, start, step = max(2, (8 * _LANES) // w), 2, 2
    best_g, best_score = start, -1.0
    for g in range(start, cap + 1, step):
        if total_rows % g:
            continue
        lin = g * w
        lout = 4 * lin if upsample else lin // 4
        eff = (lin + lout) / float(_pad128(lin) + _pad128(lout))   # lane utilisation
        bias = lin * 1e-6 if upsample else -abs(lin - 512) * 1e-6  # gentle tie-break
        score = eff + bias
        if score > best_score:
            best_g, best_score = g, score
    return best_g


# --------------------------------------------------------------------------
# selection matrices (built in the input dtype: 0 / 1 / 0.25 are exact in bf16)
# --------------------------------------------------------------------------
def _upsample_full_matrix(w, g, dtype):
    lin, wo = g * w, 2 * w
    lout = 2 * g * wo
    o = jnp.arange(lout)
    src = (o // wo // 2) * w + (o % wo) // 2
    r = (jnp.arange(lin)[:, None] == src[None, :]).astype(dtype)
    return r, lin, lout


def _upsample_row_matrix(w, dtype):
    o = jnp.arange(2 * w)
    return (jnp.arange(w)[:, None] == (o // 2)[None, :]).astype(dtype)


def _downsample_matrix(w, g, dtype):
    lin, wo = g * w, w // 2
    lout = (g // 2) * wo
    lane = jnp.arange(lin)
    dst = (lane // w // 2) * wo + (lane % w) // 2
    r = jnp.where(dst[:, None] == jnp.arange(lout)[None, :], 0.25, 0.0).astype(dtype)
    return r, lin, lout


# --------------------------------------------------------------------------
# kernels
# --------------------------------------------------------------------------
def _resample_kernel(x_ref, r_ref, o_ref):
    # (TR, Lin) @ (Lin, Lout) -> (TR, Lout); whole resample as one MXU matmul.
    o_ref[...] = jnp.dot(
        x_ref[...], r_ref[...], preferred_element_type=jnp.float32
    ).astype(o_ref.dtype)


def _upsample_split_kernel(x_ref, r_ref, o_ref):
    # Horizontal duplication via matmul; vertical duplication via two stores
    # into the output viewed as (rows, 2, 2W)  -> half the MXU work.
    d = jnp.dot(
        x_ref[...], r_ref[...], preferred_element_type=jnp.float32
    ).astype(o_ref.dtype)
    o_ref[:, 0, :] = d
    o_ref[:, 1, :] = d


# --------------------------------------------------------------------------
# pallas_call wrappers
# --------------------------------------------------------------------------
def _packed_resample(x, g, upsample):
    n, c, h, w = x.shape
    dtype = x.dtype
    itemsize = jnp.dtype(dtype).itemsize
    if upsample:
        r_mat, lin, lout = _upsample_full_matrix(w, g, dtype)
    else:
        r_mat, lin, lout = _downsample_matrix(w, g, dtype)
    xs = x.reshape(-1, lin)                     # contiguous row-major view (free)
    rin = xs.shape[0]
    sub = _sublane_multiple(dtype)
    row_bytes = (_pad128(lin) + _pad128(lout)) * itemsize
    r_bytes = lin * lout * itemsize
    target = max(1 << 20, _BLOCK_TARGET_BYTES - 2 * r_bytes)
    tr = _pick_block_rows(rin, row_bytes, sub, target)
    cost = pl.CostEstimate(
        flops=2 * rin * lin * lout,
        transcendentals=0,
        bytes_accessed=(rin * (lin + lout) + lin * lout) * itemsize,
    )
    out = pl.pallas_call(
        _resample_kernel,
        out_shape=jax.ShapeDtypeStruct((rin, lout), dtype),
        grid=(pl.cdiv(rin, tr),),
        in_specs=[
            pl.BlockSpec((tr, lin), lambda i: (i, 0)),
            pl.BlockSpec((lin, lout), lambda i: (0, 0)),   # R resident in VMEM
        ],
        out_specs=pl.BlockSpec((tr, lout), lambda i: (i, 0)),
        compiler_params=pltpu.CompilerParams(
            dimension_semantics=("parallel",),
            vmem_limit_bytes=_VMEM_LIMIT,
        ),
        cost_estimate=cost,
    )(xs, r_mat)
    if upsample:
        return out.reshape(n, c, 2 * h, 2 * w)
    return out.reshape(n, c, h // 2, w // 2)


def _split_upsample(x):
    n, c, h, w = x.shape
    dtype = x.dtype
    itemsize = jnp.dtype(dtype).itemsize
    r_mat = _upsample_row_matrix(w, dtype)      # (W, 2W)
    xs = x.reshape(-1, w)                       # (N*C*H, W), contiguous view
    rin = xs.shape[0]
    sub = _sublane_multiple(dtype)
    # out block (tr, 2, 2W): one whole sublane tile per row in VMEM.
    row_bytes = (_pad128(w) + 8 * _pad128(2 * w)) * itemsize
    r_bytes = w * 2 * w * itemsize
    target = max(1 << 20, _BLOCK_TARGET_BYTES - 2 * r_bytes)
    tr = _pick_block_rows(rin, row_bytes, sub, target)
    cost = pl.CostEstimate(
        flops=2 * rin * w * (2 * w),
        transcendentals=0,
        bytes_accessed=(rin * 5 * w + 2 * w * w) * itemsize,
    )
    out = pl.pallas_call(
        _upsample_split_kernel,
        out_shape=jax.ShapeDtypeStruct((rin, 2, 2 * w), dtype),
        grid=(pl.cdiv(rin, tr),),
        in_specs=[
            pl.BlockSpec((tr, w), lambda i: (i, 0)),
            pl.BlockSpec((w, 2 * w), lambda i: (0, 0)),
        ],
        out_specs=pl.BlockSpec((tr, 2, 2 * w), lambda i: (i, 0, 0)),
        compiler_params=pltpu.CompilerParams(
            dimension_semantics=("parallel",),
            vmem_limit_bytes=_VMEM_LIMIT,
        ),
        cost_estimate=cost,
    )(xs, r_mat)
    return out.reshape(n, c, 2 * h, 2 * w)


# --------------------------------------------------------------------------
# Public entry point (mirrors Transition.forward)
# --------------------------------------------------------------------------
def transition(x, downsample=False, upsample=False):
    """Pallas implementation of Transition.forward. x is NCHW."""
    n, c, h, w = x.shape
    if not (downsample or upsample):
        return x                                 # identity: nothing to compute
    do_up = bool(upsample)                       # both flags -> interpolate(x) wins
    if not do_up:
        assert h % 2 == 0 and w % 2 == 0, "AvgPool2d(2, stride=2) needs even H and W"
    total_rows = n * c * h
    g = _choose_group(total_rows, w, do_up)
    if do_up and g == 1 and w >= _LANES:
        return _split_upsample(x)
    return _packed_resample(x, g, do_up)


# --------------------------------------------------------------------------
# self-test
# --------------------------------------------------------------------------
if __name__ == "__main__":
    key = jax.random.PRNGKey(0)
    k1, k2, k3 = jax.random.split(key, 3)

    def ref_down(a):
        bn, bc, bh, bw = a.shape
        return a.reshape(bn, bc, bh // 2, 2, bw // 2, 2).mean(axis=(3, 5))

    def ref_up(a):
        return jnp.repeat(jnp.repeat(a, 2, axis=2), 2, axis=3)

    # 1) power-of-two spatial size (128-aligned packed path)
    x1 = jax.random.normal(k1, (2, 4, 16, 16), dtype=jnp.float32)
    y = jax.block_until_ready(transition(x1, downsample=True))
    assert y.shape == (2, 4, 8, 8)
    assert jnp.allclose(y, ref_down(x1), atol=1e-5, rtol=1e-5)
    y = jax.block_until_ready(transition(x1, upsample=True))
    assert y.shape == (2, 4, 32, 32)
    assert jnp.allclose(y, ref_up(x1), atol=1e-5, rtol=1e-5)

    # 2) DenseNet-style non-power-of-two width (packed, near-dense lanes)
    x2 = jax.random.normal(k2, (2, 6, 14, 14), dtype=jnp.float32)
    y = jax.block_until_ready(transition(x2, downsample=True))
    assert y.shape == (2, 6, 7, 7)
    assert jnp.allclose(y, ref_down(x2), atol=1e-5, rtol=1e-5)
    y = jax.block_until_ready(transition(x2, upsample=True))
    assert y.shape == (2, 6, 28, 28)
    assert jnp.allclose(y, ref_up(x2), atol=1e-5, rtol=1e-5)

    # 3) wide rows: factored (two-store) upsample kernel + packed downsample
    x3 = jax.random.normal(k3, (1, 2, 4, 128), dtype=jnp.float32)
    y = jax.block_until_ready(transition(x3, upsample=True))
    assert y.shape == (1, 2, 8, 256)
    assert jnp.allclose(y, ref_up(x3), atol=1e-5, rtol=1e-5)
    y = jax.block_until_ready(transition(x3, downsample=True))
    assert y.shape == (1, 2, 2, 64)
    assert jnp.allclose(y, ref_down(x3), atol=1e-5, rtol=1e-5)

    # 4) both flags: PyTorch forward ends with interpolate(x) -> upsample wins
    y = jax.block_until_ready(transition(x1, downsample=True, upsample=True))
    assert jnp.allclose(y, ref_up(x1), atol=1e-5, rtol=1e-5)

    # 5) identity path
    assert jnp.array_equal(transition(x1), x1)

    # 6) bf16 inputs use a native bf16 selection matrix (single MXU pass)
    xb = x1.astype(jnp.bfloat16)
    y = jax.block_until_ready(transition(xb, upsample=True))
    assert y.shape == (2, 4, 32, 32)
    assert jnp.allclose(
        y.astype(jnp.float32), ref_up(xb).astype(jnp.float32), atol=1e-2
    )

    print("KERNEL_OK")
</pallas_src>

<mosaic_0001>
module attributes {stable_mosaic.version = 11 : i64} {
  func.func @_resample_kernel(%arg0: i32, %arg1: memref<4x512xf32, #tpu.memory_space<vmem>>, %arg2: memref<512x128xf32, #tpu.memory_space<vmem>>, %arg3: memref<4x128xf32, #tpu.memory_space<vmem>>) attributes {dimension_semantics = [#tpu.dimension_semantics<parallel>], iteration_bounds = array<i64: 1>, scalar_prefetch = 0 : i64, scratch_operands = 0 : i64, tpu.core_type = #tpu.core_type<tc>, window_params = [{transform_indices = @transform_0, window_bounds = array<i64: 4, 512>}, {pipeline_mode = #tpu.pipeline_mode<synchronous>, transform_indices = @transform_1, window_bounds = array<i64: 512, 128>}, {transform_indices = @transform_2, window_bounds = array<i64: 4, 128>}]} {
    %c0 = arith.constant 0 : index
    %c0_0 = arith.constant 0 : index
    %0 = vector.load %arg1[%c0, %c0_0] : memref<4x512xf32, #tpu.memory_space<vmem>>, vector<4x512xf32>
    %c0_1 = arith.constant 0 : index
    %c0_2 = arith.constant 0 : index
    %1 = vector.load %arg2[%c0_1, %c0_2] : memref<512x128xf32, #tpu.memory_space<vmem>>, vector<512x128xf32>
    %cst = arith.constant dense<0.000000e+00> : vector<4x128xf32>
    %2 = tpu.matmul %0, %1, %cst {dimension_numbers = #tpu.dot_dimension_numbers<[1], [0], [0], [1], [0, 0, 1, 1], [], []>} : vector<4x512xf32>, vector<512x128xf32>, vector<4x128xf32> -> vector<4x128xf32>
    %c0_3 = arith.constant 0 : index
    %c0_4 = arith.constant 0 : index
    %3 = vector.load %arg3[%c0_3, %c0_4] : memref<4x128xf32, #tpu.memory_space<vmem>>, vector<4x128xf32>
    tpu.vector_store %arg3[%c0_3, %c0_4], %2 {strides = array<i32>} : memref<4x128xf32, #tpu.memory_space<vmem>>, vector<4x128xf32>,
    return
  }
  func.func @transform_0(%arg0: i32) -> (i32, i32) {
    %c0_i32 = arith.constant 0 : i32
    %c0_i32_0 = arith.constant 0 : i32
    return %arg0, %c0_i32 : i32, i32
  }
  func.func @transform_1(%arg0: i32) -> (i32, i32) {
    %c0_i32 = arith.constant 0 : i32
    %c0_i32_0 = arith.constant 0 : i32
    %c0_i32_1 = arith.constant 0 : i32
    return %c0_i32, %c0_i32_0 : i32, i32
  }
  func.func @transform_2(%arg0: i32) -> (i32, i32) {
    %c0_i32 = arith.constant 0 : i32
    %c0_i32_0 = arith.constant 0 : i32
    return %arg0, %c0_i32 : i32, i32
  }
}

</mosaic_0001>

<bundles_post_ra>
// kernel: tpu_custom_call.1
= control target key start
LH: loop header
LB: loop body
LE: loop exit
PB: predicated region body
PF: predicated region fallthrough
CT: control target
= control target key end

     0   :  { %7 = vsyncpa [#allocation3], 0  ;;  %s439_s0 = inlined_call_operand.hbm [shape: f32[4,512], index: 0, kind: input, shape index: {}]   ;;  %s440_s1 = inlined_call_operand.hbm [shape: f32[512,128], index: 1, kind: input, shape index: {}]   ;;  %s441_s2 = inlined_call_operand.hbm [shape: f32[4,128], index: 2, kind: output, shape index: {}]  }
   0x1   :  { %8 = vsyncpa [#allocation6], 0 }
   0x2   :  { %9 = vsyncpa [#allocation4], 0  ;;  %s410_s9 = smov [#allocation2]   ;;  %s411_s11 = smov [#allocation5]  }
   0x3   :  { %s16_s10 = sshll.u32 %s410_s9, 4  ;;  %s25_s12 = sshll.u32 %s411_s11, 4  ;;  %s17_s10 = int_to_ptr.vmem [resolvable:$true] %s16_s10  ;;  %s26_s12 = int_to_ptr.vmem [resolvable:$true] %s25_s12 }
   0x4   :  { %s352_s13 = scalar_lea.vmem %s17_s10, 256  ;;  %p357_p1 = scmp.lt.s32.totalorder %s17_s10, %s17_s10 }
   0x5   :  { %p353_p0 = scmp.ne.s32.totalorder %s17_s10, %s352_s13  ;;  %p358_p2 = scmp.lt.s32.totalorder %s352_s13, %s352_s13 }
   0x7   :  { %p359_p3 = por %p358_p2, %p357_p1 }
   0x9   :  { %p360_p4 = pnand %p359_p3, %p353_p0 }
   0xb   :  { %363 = shalt.err (!%p360_p4)
}
   0xc   :  { %19 = dma.hbm_to_vmem [thread:$0]  %s439_s0, 256, %s17_s10, [#allocation3]  }
   0xd   :  { %s372_s16 = scalar_lea.vmem %s26_s12, 8192  ;;  %p377_p6 = scmp.lt.s32.totalorder %s26_s12, %s26_s12 }
   0xe   :  { %p373_p5 = scmp.ne.s32.totalorder %s26_s12, %s372_s16  ;;  %p378_p7 = scmp.lt.s32.totalorder %s372_s16, %s372_s16 }
  0x10   :  { %p379_p8 = por %p378_p7, %p377_p6 }
  0x12   :  { %p380_p9 = pnand %p379_p8, %p373_p5 }
  0x14   :  { %383 = shalt.err (!%p380_p9)
}
  0x15   :  { %s412_s17 = smov 128   ;;  %s413_s18 = smov 8  }
  0x16   :  { %31 = dma.hbm_to_vmem [thread:$0]  %s440_s1, 8192, %s26_s12, [#allocation6], %s412_s17, %s412_s17, %s413_s18  }
  0x17   :  { %404 = dma.done.wait [#allocation3], 256  }
  0x18   :  { %405 = vsyncadd [#allocation3], 4294967040 }
  0x19   :  { %406 = dma.done.wait [#allocation6], 8192  }
  0x1a   :  { %407 = vsyncadd [#allocation6], 4294959104  ;;  %v71_v0 = vld [vmem:[#allocation5 + $0xf8] sm:$0xff]  ;;  %v70_v4 = vld [vmem:[#allocation5 + $0xf0] sm:$0xff]  ;;  %s414_s0 = smov [#allocation7]  }
  0x1b   :  { %v103_v1 = vld [vmem:[#allocation5 + $0x1f8] sm:$0xff]  ;;  %267 = vmatprep.subr.mxu0 %v71_v0  ;;  %v102_v5 = vld [vmem:[#allocation5 + $0x1f0] sm:$0xff]  ;;  %v69_v8 = vld [vmem:[#allocation5 + $0xe8] sm:$0xff]  ;;  %s257_s1 = sshll.u32 %s414_s0, 4  ;;  %s258_s1 = int_to_ptr.vmem [resolvable:$true] %s257_s1 }
  0x1c   :  { %v55_v2 = vld [vmem:[#allocation5 + $0x78] sm:$0xff]  ;;  %302 = vmatprep.subr.mxu1 %v103_v1  ;;  %v54_v6 = vld [vmem:[#allocation5 + $0x70] sm:$0xff]  ;;  %v101_v9 = vld [vmem:[#allocation5 + $0x1e8] sm:$0xff]  ;;  %s384_s21 = scalar_lea.vmem %s258_s1, 64  ;;  %p389_p11 = scmp.lt.s32.totalorder %s258_s1, %s258_s1 }
  0x1d   :  { %v87_v3 = vld [vmem:[#allocation5 + $0x178] sm:$0xff]  ;;  %268 = vmatpush3.msra.mxu0 %v55_v2  ;;  %v86_v7 = vld [vmem:[#allocation5 + $0x170] sm:$0xff]  ;;  %v53_v10 = vld [vmem:[#allocation5 + $0x68] sm:$0xff]  ;;  %p385_p10 = scmp.ne.s32.totalorder %s258_s1, %s384_s21  ;;  %p390_p12 = scmp.lt.s32.totalorder %s384_s21, %s384_s21 }
  0x1e   :  { %303 = vmatpush3.msra.mxu1 %v87_v3  ;;  %269 = vmatprep.subr.mxu0 %v70_v4  ;;  %v85_v11 = vld [vmem:[#allocation5 + $0x168] sm:$0xff]  ;;  %v68_v12 = vld [vmem:[#allocation5 + $0xe0] sm:$0xff]  ;;  %v67_v16 = vld [vmem:[#allocation5 + $0xd8] sm:$0xff] }
  0x1f   :  { %304 = vmatprep.subr.mxu1 %v102_v5  ;;  %270 = vmatpush3.msra.mxu0 %v54_v6  ;;  %v100_v13 = vld [vmem:[#allocation5 + $0x1e0] sm:$0xff]  ;;  %v99_v17 = vld [vmem:[#allocation5 + $0x1d8] sm:$0xff]  ;;  %v66_v20 = vld [vmem:[#allocation5 + $0xd0] sm:$0xff]  ;;  %p391_p13 = por %p390_p12, %p389_p11 }
  0x20   :  { %305 = vmatpush3.msra.mxu1 %v86_v7  ;;  %271 = vmatprep.subr.mxu0 %v69_v8  ;;  %v52_v14 = vld [vmem:[#allocation5 + $0x60] sm:$0xff]  ;;  %v51_v18 = vld [vmem:[#allocation5 + $0x58] sm:$0xff]  ;;  %v98_v21 = vld [vmem:[#allocation5 + $0x1d0] sm:$0xff] }
  0x21   :  { %306 = vmatprep.subr.mxu1 %v101_v9  ;;  %v84_v15 = vld [vmem:[#allocation5 + $0x160] sm:$0xff]  ;;  %272 = vmatpush3.msra.mxu0 %v53_v10  ;;  %v83_v19 = vld [vmem:[#allocation5 + $0x158] sm:$0xff]  ;;  %v50_v22 = vld [vmem:[#allocation5 + $0x50] sm:$0xff]  ;;  %p392_p0 = pnand %p391_p13, %p385_p10 }
  0x22   :  { %307 = vmatpush3.msra.mxu1 %v85_v11  ;;  %273 = vmatprep.subr.mxu0 %v68_v12  ;;  %v82_v23 = vld [vmem:[#allocation5 + $0x150] sm:$0xff]  ;;  %v65_v24 = vld [vmem:[#allocation5 + $0xc8] sm:$0xff]  ;;  %v64_v28 = vld [vmem:[#allocation5 + $0xc0] sm:$0xff] }
  0x23   :  { %308 = vmatprep.subr.mxu1 %v100_v13  ;;  %274 = vmatpush3.msra.mxu0 %v52_v14  ;;  %v97_v25 = vld [vmem:[#allocation5 + $0x1c8] sm:$0xff]  ;;  %v96_v29 = vld [vmem:[#allocation5 + $0x1c0] sm:$0xff]  ;;  %v63_v32 = vld [vmem:[#allocation5 + $0xb8] sm:$0xff] }
  0x24   :  { %309 = vmatpush3.msra.mxu1 %v84_v15  ;;  %275 = vmatprep.subr.mxu0 %v67_v16  ;;  %v49_v26 = vld [vmem:[#allocation5 + $0x48] sm:$0xff]  ;;  %v48_v30 = vld [vmem:[#allocation5 + $0x40] sm:$0xff]  ;;  %v95_v33 = vld [vmem:[#allocation5 + $0x1b8] sm:$0xff] }
  0x25   :  { %310 = vmatprep.subr.mxu1 %v99_v17  ;;  %276 = vmatpush3.msra.mxu0 %v51_v18  ;;  %v81_v27 = vld [vmem:[#allocation5 + $0x148] sm:$0xff]  ;;  %v80_v31 = vld [vmem:[#allocation5 + $0x140] sm:$0xff]  ;;  %v47_v34 = vld [vmem:[#allocation5 + $0x38] sm:$0xff] }
  0x26   :  { %311 = vmatpush3.msra.mxu1 %v83_v19  ;;  %277 = vmatprep.subr.mxu0 %v66_v20  ;;  %v79_v35 = vld [vmem:[#allocation5 + $0x138] sm:$0xff]  ;;  %v62_v36 = vld [vmem:[#allocation5 + $0xb0] sm:$0xff]  ;;  %v61_v40 = vld [vmem:[#allocation5 + $0xa8] sm:$0xff] }
  0x27   :  { %312 = vmatprep.subr.mxu1 %v98_v21  ;;  %278 = vmatpush3.msra.mxu0 %v50_v22  ;;  %v94_v37 = vld [vmem:[#allocation5 + $0x1b0] sm:$0xff]  ;;  %v93_v41 = vld [vmem:[#allocation5 + $0x1a8] sm:$0xff]  ;;  %v60_v44 = vld [vmem:[#allocation5 + $0xa0] sm:$0xff] }
  0x28   :  { %313 = vmatpush3.msra.mxu1 %v82_v23  ;;  %279 = vmatprep.subr.mxu0 %v65_v24  ;;  %v46_v38 = vld [vmem:[#allocation5 + $0x30] sm:$0xff]  ;;  %v45_v42 = vld [vmem:[#allocation5 + $0x28] sm:$0xff]  ;;  %v92_v45 = vld [vmem:[#allocation5 + $0x1a0] sm:$0xff] }
  0x29   :  { %314 = vmatprep.subr.mxu1 %v97_v25  ;;  %280 = vmatpush3.msra.mxu0 %v49_v26  ;;  %v78_v39 = vld [vmem:[#allocation5 + $0x130] sm:$0xff]  ;;  %v77_v43 = vld [vmem:[#allocation5 + $0x128] sm:$0xff]  ;;  %v44_v46 = vld [vmem:[#allocation5 + $0x20] sm:$0xff] }
  0x2a   :  { %315 = vmatpush3.msra.mxu1 %v81_v27  ;;  %281 = vmatprep.subr.mxu0 %v64_v28  ;;  %v76_v47 = vld [vmem:[#allocation5 + $0x120] sm:$0xff]  ;;  %v59_v48 = vld [vmem:[#allocation5 + $0x98] sm:$0xff]  ;;  %v58_v52 = vld [vmem:[#allocation5 + $0x90] sm:$0xff] }
  0x2b   :  { %316 = vmatprep.subr.mxu1 %v96_v29  ;;  %282 = vmatpush3.msra.mxu0 %v48_v30  ;;  %v91_v49 = vld [vmem:[#allocation5 + $0x198] sm:$0xff]  ;;  %v90_v53 = vld [vmem:[#allocation5 + $0x190] sm:$0xff]  ;;  %v57_v57 = vld [vmem:[#allocation5 + $0x88] sm:$0xff] }
  0x2c   :  { %317 = vmatpush3.msra.mxu1 %v80_v31  ;;  %283 = vmatprep.subr.mxu0 %v63_v32  ;;  %v43_v50 = vld [vmem:[#allocation5 + $0x18] sm:$0xff]  ;;  %v42_v54 = vld [vmem:[#allocation5 + $0x10] sm:$0xff]  ;;  %v89_v58 = vld [vmem:[#allocation5 + $0x188] sm:$0xff] }
  0x2d   :  { %318 = vmatprep.subr.mxu1 %v95_v33  ;;  %284 = vmatpush3.msra.mxu0 %v47_v34  ;;  %v75_v51 = vld [vmem:[#allocation5 + $0x118] sm:$0xff]  ;;  %v74_v55 = vld [vmem:[#allocation5 + $0x110] sm:$0xff]  ;;  %v41_v60 = vld [vmem:[#allocation5 + $0x8] sm:$0xff] }
  0x2e   :  { %319 = vmatpush3.msra.mxu1 %v79_v35  ;;  %285 = vmatprep.subr.mxu0 %v62_v36  ;;  %v38_v56 = vld [vmem:[#allocation2] sm:$0xff]  ;;  %v39_v59 = vld [vmem:[#allocation2 + $0x8] sm:$0xff]  ;;  %v73_v61 = vld [vmem:[#allocation5 + $0x108] sm:$0xff] }
  0x2f   :  { %320 = vmatprep.subr.mxu1 %v94_v37  ;;  %286 = vmatpush3.msra.mxu0 %v46_v38  ;;  %v56_v62 = vld [vmem:[#allocation5 + $0x80] sm:$0xff]  ;;  %v106_v0 = vcombine.high %v38_v56, %v38_v56  ;;  %v107_v2 = vcombine.high %v39_v59, %v39_v59 }
  0x30   :  { %321 = vmatpush3.msra.mxu1 %v78_v39  ;;  %287 = vmatprep.subr.mxu0 %v61_v40  ;;  %v88_v63 = vld [vmem:[#allocation5 + $0x180] sm:$0xff] }
  0x31   :  { %322 = vmatprep.subr.mxu1 %v93_v41  ;;  %288 = vmatpush3.msra.mxu0 %v45_v42  ;;  %v40_v1 = vld [vmem:[#allocation5] sm:$0xff] }
  0x32   :  { %323 = vmatpush3.msra.mxu1 %v77_v43  ;;  %289 = vmatprep.subr.mxu0 %v60_v44  ;;  %v72_v3 = vld [vmem:[#allocation5 + $0x100] sm:$0xff] }
  0x33   :  { %324 = vmatprep.subr.mxu1 %v92_v45  ;;  %290 = vmatpush3.msra.mxu0 %v44_v46 }
  0x34   :  { %325 = vmatpush3.msra.mxu1 %v76_v47  ;;  %291 = vmatprep.subr.mxu0 %v59_v48 }
  0x35   :  { %326 = vmatprep.subr.mxu1 %v91_v49  ;;  %292 = vmatpush3.msra.mxu0 %v43_v50 }
  0x36   :  { %327 = vmatpush3.msra.mxu1 %v75_v51  ;;  %293 = vmatprep.subr.mxu0 %v58_v52 }
  0x37   :  { %328 = vmatprep.subr.mxu1 %v90_v53  ;;  %294 = vmatpush3.msra.mxu0 %v42_v54 }
  0x38   :  { %329 = vmatpush3.msra.mxu1 %v74_v55  ;;  %295 = vmatprep.subr.mxu0 %v57_v57 }
  0x39   :  { %330 = vmatprep.subr.mxu1 %v89_v58  ;;  %296 = vmatpush3.msra.mxu0 %v41_v60 }
  0x3a   :  { %331 = vmatpush3.msra.mxu1 %v73_v61  ;;  %297 = vmatprep.subr.mxu0 %v56_v62 }
  0x3b   :  { %332 = vmatprep.subr.mxu1 %v88_v63  ;;  %298 = vmatpush3.msra.mxu0 %v40_v1 }
  0x3c   :  { %174 = vmatprep.mubr.f32.mxu0 %v106_v0  ;;  %333 = vmatpush3.msra.mxu1 %v72_v3 }
  0x3d   :  { %244 = vmatprep.mubr.f32.mxu1 %v107_v2  ;;  %175 = vmatmul.mubr.f32.vlgmr.msra.gmra.mxu0 %v38_v56 }
  0x3e   :  { %245 = vmatmul.mubr.f32.vlgmr.msra.gmra.mxu1 %v39_v59 }
  0xfd   :  { %v299_v4 = vpop.f32.mrf.mxu0 }
  0xfe   :  { %v334_v5 = vpop.f32.mrf.mxu1 }
  0xff   :  { %v300_v6 = vpop.f32.mrf.mxu0 }
 0x100   :  { %v335_v7 = vpop.f32.mrf.mxu1  ;;  %v301_v8 = vadd.f32 %v300_v6, %v299_v4 }
 0x101   :  { %v336_v9 = vadd.f32 %v335_v7, %v334_v5 }
 0x103   :  { %v247_v10 = vadd.f32 %v336_v9, %v301_v8 }
 0x105   :  { %250 = vst [vmem:[#allocation7] sm:$0xf] %v247_v10 }
 0x106   :  { %395 = shalt.err (!%p392_p0)
}
 0x107   :  { %260 = dma.vmem_to_hbm [thread:$0]  %s258_s1, 64, %s441_s2, [#allocation4]  }
 0x108   :  { %408 = dma.done.wait [#allocation4], 64  }
 0x109   :  { %409 = vsyncadd [#allocation4], 4294967232 }
 0x10a   :  { %264 = vsyncpa [#allocation3], 1 }
 0x10b   :  { %265 = vsyncpa [#allocation6], 1 }
 0x10c   :  { %266 = vsyncpa [#allocation4], 1 }

</bundles_post_ra>
